<compile_context>
chip_gen: v7x
topology: tpu7x:2x2x1
jax: 0.10.0
libtpu: 0.0.40
codegen_flags: <defaults>
</compile_context>

<pallas_src>
import math

import jax
import jax.numpy as jnp
from jax.experimental import pallas as pl
from jax.experimental.pallas import tpu as pltpu


# ----------------------------------------------------------------------------
# In-kernel helpers (traced inside Pallas kernels)
# ----------------------------------------------------------------------------
def _layernorm(x, g, b, eps=1e-5):
    # x: (T, C) f32, g/b: (1, C) f32
    mu = jnp.mean(x, axis=-1, keepdims=True)
    xc = x - mu
    var = jnp.mean(xc * xc, axis=-1, keepdims=True)
    return xc * jax.lax.rsqrt(var + eps) * g + b


def _erf(x):
    # Abramowitz & Stegun 7.1.26 polynomial approximation (|err| ~ 1.5e-7),
    # built only from ops with guaranteed Mosaic lowerings (exp, mul, where).
    a1, a2, a3, a4, a5 = (0.254829592, -0.284496736, 1.421413741,
                          -1.453152027, 1.061405429)
    pp = 0.3275911
    ax = jnp.abs(x)
    t = pl.reciprocal(1.0 + pp * ax, approx=True)
    poly = ((((a5 * t + a4) * t + a3) * t + a2) * t + a1) * t
    y = 1.0 - poly * jnp.exp(-ax * ax)
    return jnp.where(x >= 0, y, -y)


def _gelu_exact(x):
    # Matches PyTorch F.gelu default (erf-based, not tanh approximation).
    return 0.5 * x * (1.0 + _erf(x * 0.7071067811865476))


def _mha(xn, kv, wq, wk, wv, wo, bo, num_heads, scale):
    """Multi-head attention core with heads as a dot_general batch dim.

    xn: (T, C) f32 query source (already LayerNormed)
    kv: (S, Ckv) f32 key/value source, or None to reuse xn (self-attention)
    wq: (H, C, D) bf16, wk/wv: (H, Ckv, D) bf16, wo: (H, D, C) bf16
    bo: (1, C) f32
    """
    H = num_heads
    bf16 = jnp.bfloat16
    f32 = jnp.float32

    xb = jnp.broadcast_to(xn.astype(bf16), (H,) + xn.shape)        # (H, T, C)
    if kv is None:
        kvb = xb                                                    # self-attn
    else:
        kvb = jnp.broadcast_to(kv.astype(bf16), (H,) + kv.shape)    # (H, S, Ckv)

    q = jnp.einsum('htc,hcd->htd', xb, wq, preferred_element_type=f32) * scale
    k = jnp.einsum('hsc,hcd->hsd', kvb, wk, preferred_element_type=f32)
    v = jnp.einsum('hsc,hcd->hsd', kvb, wv, preferred_element_type=f32)

    s = jnp.einsum('htd,hsd->hts', q.astype(bf16), k.astype(bf16),
                   preferred_element_type=f32)                      # (H, T, S)
    m = jnp.max(s, axis=-1, keepdims=True)
    p = jnp.exp(s - m)                                              # f32
    l = jnp.sum(p, axis=-1, keepdims=True)                          # (H, T, 1)

    ctx = jnp.einsum('hts,hsd->htd', p.astype(bf16), v.astype(bf16),
                     preferred_element_type=f32)                    # (H, T, D)
    # Deferred softmax normalization: one (T,D)-sized multiply via EUP recip.
    ctx = ctx * pl.reciprocal(l, approx=True)

    o = jnp.einsum('htd,hdc->htc', ctx.astype(bf16), wo,
                   preferred_element_type=f32)                      # (H, T, C)
    return jnp.sum(o, axis=0) + bo                                  # (T, C)


# ----------------------------------------------------------------------------
# Kernel bodies
# ----------------------------------------------------------------------------
def make_gn_projin_kernel(eps=1e-6):
    # GroupNorm(num_groups) over (channels-in-group x spatial) + 1x1 conv.
    # Group reductions/broadcasts are done with tiny one-hot matmuls so no
    # lane-splitting reshapes are needed in-kernel.
    def kernel(x_ref, g_ref, b_ref, m_ref, mt_ref, w_ref, bias_ref, out_ref):
        x = x_ref[0]                                   # (T, C) f32
        T, C = x.shape
        G = m_ref.shape[1]
        inv_n = 1.0 / float(T * (C // G))

        s1 = jnp.sum(x, axis=0, keepdims=True)         # (1, C)
        s2 = jnp.sum(x * x, axis=0, keepdims=True)     # (1, C)
        gs1 = jnp.dot(s1, m_ref[...], preferred_element_type=jnp.float32)
        gs2 = jnp.dot(s2, m_ref[...], preferred_element_type=jnp.float32)
        gmean = gs1 * inv_n                            # (1, G)
        gvar = gs2 * inv_n - gmean * gmean             # (1, G) biased variance
        mean_c = jnp.dot(gmean, mt_ref[...], preferred_element_type=jnp.float32)
        var_c = jnp.dot(gvar, mt_ref[...], preferred_element_type=jnp.float32)

        scale_c = g_ref[...] * jax.lax.rsqrt(var_c + eps)   # (1, C)
        shift_c = b_ref[...] - mean_c * scale_c
        xn = x * scale_c + shift_c                           # (T, C)

        y = jnp.dot(xn.astype(jnp.bfloat16), w_ref[...],
                    preferred_element_type=jnp.float32) + bias_ref[...]
        out_ref[0] = y.astype(out_ref.dtype)
    return kernel


def make_self_attn_kernel(num_heads, head_dim, eps=1e-5):
    scale = 1.0 / math.sqrt(head_dim)

    def kernel(x_ref, g_ref, b_ref, wq_ref, wk_ref, wv_ref, wo_ref, bo_ref,
               out_ref):
        x = x_ref[0]                                    # (T, C) f32
        xn = _layernorm(x, g_ref[...], b_ref[...], eps)
        attn = _mha(xn, None, wq_ref[...], wk_ref[...], wv_ref[...],
                    wo_ref[...], bo_ref[...], num_heads, scale)
        out_ref[0] = (x + attn).astype(out_ref.dtype)   # residual fused
    return kernel


def make_cross_attn_kernel(num_heads, head_dim, eps=1e-5):
    scale = 1.0 / math.sqrt(head_dim)

    def kernel(x_ref, ctx_ref, g_ref, b_ref, wq_ref, wk_ref, wv_ref, wo_ref,
               bo_ref, out_ref):
        x = x_ref[0]                                    # (T, C) f32
        c = ctx_ref[0]                                  # (S, Cd) f32
        xn = _layernorm(x, g_ref[...], b_ref[...], eps)
        attn = _mha(xn, c, wq_ref[...], wk_ref[...], wv_ref[...],
                    wo_ref[...], bo_ref[...], num_heads, scale)
        out_ref[0] = (x + attn).astype(out_ref.dtype)   # residual fused
    return kernel


def make_ff_kernel(eps=1e-5):
    def kernel(x_ref, g_ref, b_ref, w1_ref, b1_ref, w2_ref, b2_ref, out_ref):
        x = x_ref[0]                                    # (T, C) f32
        xn = _layernorm(x, g_ref[...], b_ref[...], eps)
        h = jnp.dot(xn.astype(jnp.bfloat16), w1_ref[...],
                    preferred_element_type=jnp.float32) + b1_ref[...]
        half = h.shape[-1] // 2                         # multiple of 128
        a = h[:, :half]
        gates = h[:, half:]
        y = a * _gelu_exact(gates)
        out = jnp.dot(y.astype(jnp.bfloat16), w2_ref[...],
                      preferred_element_type=jnp.float32) + b2_ref[...]
        out_ref[0] = (x + out).astype(out_ref.dtype)    # residual fused
    return kernel


def make_projout_kernel():
    def kernel(x_ref, res_ref, w_ref, b_ref, out_ref):
        x = x_ref[0]                                    # (T, C) f32
        y = jnp.dot(x.astype(jnp.bfloat16), w_ref[...],
                    preferred_element_type=jnp.float32) + b_ref[...]
        out_ref[0] = (y + res_ref[0]).astype(out_ref.dtype)
    return kernel


# ----------------------------------------------------------------------------
# pallas_call plumbing: grid over batch, constants broadcast to every step
# ----------------------------------------------------------------------------
def _pallas_batched(kernel, batched, consts, out_shape_btc):
    B = batched[0].shape[0]

    def bspec(a):
        nzeros = a.ndim - 1
        idx = lambda i: (i,) + (0,) * nzeros
        return pl.BlockSpec((1,) + a.shape[1:], idx)

    def cspec(a):
        nzeros = a.ndim
        idx = lambda i: (0,) * nzeros
        return pl.BlockSpec(a.shape, idx)

    in_specs = [bspec(a) for a in batched] + [cspec(a) for a in consts]
    out_nzeros = len(out_shape_btc) - 1
    out_spec = pl.BlockSpec((1,) + tuple(out_shape_btc[1:]),
                            lambda i: (i,) + (0,) * out_nzeros)

    return pl.pallas_call(
        kernel,
        out_shape=jax.ShapeDtypeStruct(tuple(out_shape_btc), jnp.float32),
        grid_spec=pltpu.PrefetchScalarGridSpec(
            num_scalar_prefetch=0,
            grid=(B,),
            in_specs=in_specs,
            out_specs=out_spec,
        ),
        compiler_params=pltpu.CompilerParams(
            dimension_semantics=("parallel",)),
    )(*batched, *consts)


# ----------------------------------------------------------------------------
# Full SpatialTransformer forward
# ----------------------------------------------------------------------------
def spatial_transformer_pallas(x, cond, p, num_heads=8, num_groups=32):
    B, C, Hh, Ww = x.shape
    T = Hh * Ww
    E = p['attn1_q'].shape[0]       # embed_dim == hidden_dim in this module
    D = E // num_heads
    f32, bf16 = jnp.float32, jnp.bfloat16

    # ---- wrapper-side layout / weight preprocessing (one-time, no in-kernel .T)
    x_tok = x.reshape(B, C, T).transpose(0, 2, 1).astype(f32)       # (B, T, C)

    Cg = C // num_groups
    gmap = (jnp.arange(C)[:, None] // Cg ==
            jnp.arange(num_groups)[None, :]).astype(f32)            # (C, G)
    gmap_t = jnp.transpose(gmap)                                    # (G, C)

    def row(v):
        return v.reshape(1, -1).astype(f32)

    def heads_in(w):    # torch Linear weight (E, Cin) -> (H, Cin, D) bf16
        cin = w.shape[1]
        return w.T.reshape(cin, num_heads, D).transpose(1, 0, 2).astype(bf16)

    def heads_out(w):   # torch Linear weight (Cout, E) -> (H, D, Cout) bf16
        cout = w.shape[0]
        return w.T.reshape(num_heads, D, cout).astype(bf16)

    # 1) GroupNorm + proj_in (1x1 conv == per-token Linear)
    h = _pallas_batched(
        make_gn_projin_kernel(eps=1e-6),
        batched=[x_tok],
        consts=[row(p['gn_g']), row(p['gn_b']), gmap, gmap_t,
                p['pi_w'].T.astype(bf16), row(p['pi_b'])],
        out_shape_btc=(B, T, C))

    # 2) x = attn1(norm1(x)) + x   (self-attention)
    h = _pallas_batched(
        make_self_attn_kernel(num_heads, D),
        batched=[h],
        consts=[row(p['ln1_g']), row(p['ln1_b']),
                heads_in(p['attn1_q']), heads_in(p['attn1_k']),
                heads_in(p['attn1_v']),
                heads_out(p['attn1_ow']), row(p['attn1_ob'])],
        out_shape_btc=(B, T, C))

    # 3) x = attn2(norm2(x), cond) + x   (cross-attention)
    h = _pallas_batched(
        make_cross_attn_kernel(num_heads, D),
        batched=[h, cond.astype(f32)],
        consts=[row(p['ln2_g']), row(p['ln2_b']),
                heads_in(p['attn2_q']), heads_in(p['attn2_k']),
                heads_in(p['attn2_v']),
                heads_out(p['attn2_ow']), row(p['attn2_ob'])],
        out_shape_btc=(B, T, C))

    # 4) x = ff(norm3(x)) + x   (GEGLU feed-forward; Dropout(0.0) is a no-op)
    h = _pallas_batched(
        make_ff_kernel(),
        batched=[h],
        consts=[row(p['ln3_g']), row(p['ln3_b']),
                p['ff1_w'].T.astype(bf16), row(p['ff1_b']),
                p['ff2_w'].T.astype(bf16), row(p['ff2_b'])],
        out_shape_btc=(B, T, C))

    # 5) proj_out (1x1 conv) + residual with the original input (token layout)
    out_tok = _pallas_batched(
        make_projout_kernel(),
        batched=[h, x_tok],
        consts=[p['po_w'].T.astype(bf16), row(p['po_b'])],
        out_shape_btc=(B, T, C))

    return out_tok.transpose(0, 2, 1).reshape(B, C, Hh, Ww)


# ----------------------------------------------------------------------------
# Pure-JAX reference matching the PyTorch module (f32)
# ----------------------------------------------------------------------------
def spatial_transformer_ref(x, cond, p, num_heads=8, num_groups=32):
    B, C, Hh, Ww = x.shape

    xg = x.reshape(B, num_groups, C // num_groups, Hh, Ww)
    mu = jnp.mean(xg, axis=(2, 3, 4), keepdims=True)
    var = jnp.mean((xg - mu) ** 2, axis=(2, 3, 4), keepdims=True)
    xn = ((xg - mu) / jnp.sqrt(var + 1e-6)).reshape(B, C, Hh, Ww)
    xn = xn * p['gn_g'][None, :, None, None] + p['gn_b'][None, :, None, None]

    h = jnp.einsum('bchw,oc->bohw', xn, p['pi_w']) + p['pi_b'][None, :, None, None]
    t = h.reshape(B, C, Hh * Ww).transpose(0, 2, 1)                 # (B, T, C)

    def layernorm(z, g, b, eps=1e-5):
        m = jnp.mean(z, axis=-1, keepdims=True)
        v = jnp.mean((z - m) ** 2, axis=-1, keepdims=True)
        return (z - m) / jnp.sqrt(v + eps) * g + b

    def attention(zq, zkv, wq, wk, wv, wo, bo):
        E = wq.shape[0]
        D = E // num_heads
        q, k, v = zq @ wq.T, zkv @ wk.T, zkv @ wv.T

        def split(u):
            b_, s_, _ = u.shape
            return u.reshape(b_, s_, num_heads, D).transpose(0, 2, 1, 3)

        qh, kh, vh = split(q), split(k), split(v)
        sc = jnp.einsum('bhtd,bhsd->bhts', qh, kh) / math.sqrt(D)
        a = jax.nn.softmax(sc, axis=-1)
        cv = jnp.einsum('bhts,bhsd->bhtd', a, vh)
        cv = cv.transpose(0, 2, 1, 3).reshape(zq.shape[0], zq.shape[1], E)
        return cv @ wo.T + bo

    tn = layernorm(t, p['ln1_g'], p['ln1_b'])
    t = attention(tn, tn, p['attn1_q'], p['attn1_k'], p['attn1_v'],
                  p['attn1_ow'], p['attn1_ob']) + t
    tn = layernorm(t, p['ln2_g'], p['ln2_b'])
    t = attention(tn, cond, p['attn2_q'], p['attn2_k'], p['attn2_v'],
                  p['attn2_ow'], p['attn2_ob']) + t
    tn = layernorm(t, p['ln3_g'], p['ln3_b'])
    hff = tn @ p['ff1_w'].T + p['ff1_b']
    half = hff.shape[-1] // 2
    a_part, gates = hff[..., :half], hff[..., half:]
    gelu = 0.5 * gates * (1.0 + jax.lax.erf(gates / math.sqrt(2.0)))
    t = (a_part * gelu) @ p['ff2_w'].T + p['ff2_b'] + t

    hh = t.transpose(0, 2, 1).reshape(B, C, Hh, Ww)
    return (jnp.einsum('bchw,oc->bohw', hh, p['po_w'])
            + p['po_b'][None, :, None, None] + x)


# ----------------------------------------------------------------------------
# Parameter init (PyTorch-style uniform fan-in bounds, deterministic)
# ----------------------------------------------------------------------------
def init_params(key, hidden, context_dim, mult=4):
    keys = iter(jax.random.split(key, 26))

    def nk():
        return next(keys)

    def lin_w(out_f, in_f):
        bound = 1.0 / math.sqrt(in_f)
        return jax.random.uniform(nk(), (out_f, in_f), jnp.float32, -bound, bound)

    def lin_b(out_f, in_f):
        bound = 1.0 / math.sqrt(in_f)
        return jax.random.uniform(nk(), (out_f,), jnp.float32, -bound, bound)

    def norm_g(n):
        return 1.0 + 0.1 * jax.random.normal(nk(), (n,), jnp.float32)

    def norm_b(n):
        return 0.1 * jax.random.normal(nk(), (n,), jnp.float32)

    E = hidden
    inner = mult * hidden
    return dict(
        gn_g=norm_g(hidden), gn_b=norm_b(hidden),
        pi_w=lin_w(hidden, hidden), pi_b=lin_b(hidden, hidden),
        ln1_g=norm_g(hidden), ln1_b=norm_b(hidden),
        attn1_q=lin_w(E, hidden), attn1_k=lin_w(E, hidden),
        attn1_v=lin_w(E, hidden),
        attn1_ow=lin_w(hidden, E), attn1_ob=lin_b(hidden, E),
        ln2_g=norm_g(hidden), ln2_b=norm_b(hidden),
        attn2_q=lin_w(E, hidden), attn2_k=lin_w(E, context_dim),
        attn2_v=lin_w(E, context_dim),
        attn2_ow=lin_w(hidden, E), attn2_ob=lin_b(hidden, E),
        ln3_g=norm_g(hidden), ln3_b=norm_b(hidden),
        ff1_w=lin_w(2 * inner, hidden), ff1_b=lin_b(2 * inner, hidden),
        ff2_w=lin_w(hidden, inner), ff2_b=lin_b(hidden, inner),
        po_w=lin_w(hidden, hidden), po_b=lin_b(hidden, hidden),
    )


if __name__ == "__main__":
    B = 2
    hidden = 128          # channels; GroupNorm(32, hidden) needs hidden % 32 == 0
    Hh = Ww = 8           # spatial -> T = 64 tokens, lane-dense C = 128
    S = 8                 # context (cond) sequence length
    context_dim = 64
    num_heads = 8         # head_dim = 16

    key = jax.random.PRNGKey(0)
    kx, kc, kp = jax.random.split(key, 3)
    x = jax.random.normal(kx, (B, hidden, Hh, Ww), jnp.float32)
    cond = jax.random.normal(kc, (B, S, context_dim), jnp.float32)
    params = init_params(kp, hidden, context_dim)

    out = spatial_transformer_pallas(x, cond, params, num_heads=num_heads)
    out = jax.block_until_ready(out)

    ref = spatial_transformer_ref(x, cond, params, num_heads=num_heads)
    assert out.shape == x.shape
    # bf16 MXU operands with f32 accumulation -> compare at bf16-level tolerance.
    assert jnp.allclose(out, ref, atol=5e-2, rtol=5e-2), (
        "mismatch vs reference (max abs err "
        f"{float(jnp.max(jnp.abs(out - ref)))})")
    print("KERNEL_OK")
</pallas_src>

<mosaic_0001>
module attributes {stable_mosaic.version = 11 : i64} {
  func.func @kernel(%arg0: i32, %arg1: memref<1x64x128xf32, #tpu.memory_space<vmem>>, %arg2: memref<1x128xf32, #tpu.memory_space<vmem>>, %arg3: memref<1x128xf32, #tpu.memory_space<vmem>>, %arg4: memref<128x32xf32, #tpu.memory_space<vmem>>, %arg5: memref<32x128xf32, #tpu.memory_space<vmem>>, %arg6: memref<128x128xbf16, #tpu.memory_space<vmem>>, %arg7: memref<1x128xf32, #tpu.memory_space<vmem>>, %arg8: memref<1x64x128xf32, #tpu.memory_space<vmem>>) attributes {dimension_semantics = [#tpu.dimension_semantics<parallel>], iteration_bounds = array<i64: 2>, scalar_prefetch = 0 : i64, scratch_operands = 0 : i64, tpu.core_type = #tpu.core_type<tc>, window_params = [{transform_indices = @transform_0, window_bounds = array<i64: 1, 64, 128>}, {pipeline_mode = #tpu.pipeline_mode<synchronous>, transform_indices = @transform_1, window_bounds = array<i64: 1, 128>}, {pipeline_mode = #tpu.pipeline_mode<synchronous>, transform_indices = @transform_2, window_bounds = array<i64: 1, 128>}, {pipeline_mode = #tpu.pipeline_mode<synchronous>, transform_indices = @transform_3, window_bounds = array<i64: 128, 32>}, {pipeline_mode = #tpu.pipeline_mode<synchronous>, transform_indices = @transform_4, window_bounds = array<i64: 32, 128>}, {pipeline_mode = #tpu.pipeline_mode<synchronous>, transform_indices = @transform_5, window_bounds = array<i64: 128, 128>}, {pipeline_mode = #tpu.pipeline_mode<synchronous>, transform_indices = @transform_6, window_bounds = array<i64: 1, 128>}, {transform_indices = @transform_7, window_bounds = array<i64: 1, 64, 128>}]} {
    %c0 = arith.constant 0 : index
    %c0_0 = arith.constant 0 : index
    %c0_1 = arith.constant 0 : index
    %0 = vector.load %arg1[%c0, %c0_0, %c0_1] : memref<1x64x128xf32, #tpu.memory_space<vmem>>, vector<1x64x128xf32>
    %1 = vector.shape_cast %0 : vector<1x64x128xf32> to vector<64x128xf32>
    %cst = arith.constant dense<0.000000e+00> : vector<128xf32>
    %2 = vector.multi_reduction <add>, %1, %cst [0] : vector<64x128xf32> to vector<128xf32>
    %3 = vector.shape_cast %2 : vector<128xf32> to vector<1x128xf32>
    %4 = arith.mulf %1, %1 : vector<64x128xf32>
    %cst_2 = arith.constant dense<0.000000e+00> : vector<128xf32>
    %5 = vector.multi_reduction <add>, %4, %cst_2 [0] : vector<64x128xf32> to vector<128xf32>
    %6 = vector.shape_cast %5 : vector<128xf32> to vector<1x128xf32>
    %c0_3 = arith.constant 0 : index
    %c0_4 = arith.constant 0 : index
    %7 = vector.load %arg4[%c0_3, %c0_4] : memref<128x32xf32, #tpu.memory_space<vmem>>, vector<128x32xf32>
    %cst_5 = arith.constant dense<0.000000e+00> : vector<1x32xf32>
    %8 = tpu.matmul %3, %7, %cst_5 {dimension_numbers = #tpu.dot_dimension_numbers<[1], [0], [0], [1], [0, 0, 1, 1], [], []>} : vector<1x128xf32>, vector<128x32xf32>, vector<1x32xf32> -> vector<1x32xf32>
    %c0_6 = arith.constant 0 : index
    %c0_7 = arith.constant 0 : index
    %9 = vector.load %arg4[%c0_6, %c0_7] : memref<128x32xf32, #tpu.memory_space<vmem>>, vector<128x32xf32>
    %cst_8 = arith.constant dense<0.000000e+00> : vector<1x32xf32>
    %10 = tpu.matmul %6, %9, %cst_8 {dimension_numbers = #tpu.dot_dimension_numbers<[1], [0], [0], [1], [0, 0, 1, 1], [], []>} : vector<1x128xf32>, vector<128x32xf32>, vector<1x32xf32> -> vector<1x32xf32>
    %cst_9 = arith.constant 3.906250e-03 : f32
    %11 = vector.broadcast %cst_9 : f32 to vector<1x32xf32>
    %12 = arith.mulf %8, %11 : vector<1x32xf32>
    %cst_10 = arith.constant 3.906250e-03 : f32
    %13 = vector.broadcast %cst_10 : f32 to vector<1x32xf32>
    %14 = arith.mulf %10, %13 : vector<1x32xf32>
    %15 = arith.mulf %12, %12 : vector<1x32xf32>
    %16 = arith.subf %14, %15 : vector<1x32xf32>
    %c0_11 = arith.constant 0 : index
    %c0_12 = arith.constant 0 : index
    %17 = vector.load %arg5[%c0_11, %c0_12] : memref<32x128xf32, #tpu.memory_space<vmem>>, vector<32x128xf32>
    %cst_13 = arith.constant dense<0.000000e+00> : vector<1x128xf32>
    %18 = tpu.matmul %12, %17, %cst_13 {dimension_numbers = #tpu.dot_dimension_numbers<[1], [0], [0], [1], [0, 0, 1, 1], [], []>} : vector<1x32xf32>, vector<32x128xf32>, vector<1x128xf32> -> vector<1x128xf32>
    %c0_14 = arith.constant 0 : index
    %c0_15 = arith.constant 0 : index
    %19 = vector.load %arg5[%c0_14, %c0_15] : memref<32x128xf32, #tpu.memory_space<vmem>>, vector<32x128xf32>
    %cst_16 = arith.constant dense<0.000000e+00> : vector<1x128xf32>
    %20 = tpu.matmul %16, %19, %cst_16 {dimension_numbers = #tpu.dot_dimension_numbers<[1], [0], [0], [1], [0, 0, 1, 1], [], []>} : vector<1x32xf32>, vector<32x128xf32>, vector<1x128xf32> -> vector<1x128xf32>
    %c0_17 = arith.constant 0 : index
    %c0_18 = arith.constant 0 : index
    %21 = vector.load %arg2[%c0_17, %c0_18] : memref<1x128xf32, #tpu.memory_space<vmem>>, vector<1x128xf32>
    %cst_19 = arith.constant 9.99999997E-7 : f32
    %22 = vector.broadcast %cst_19 : f32 to vector<1x128xf32>
    %23 = arith.addf %20, %22 : vector<1x128xf32>
    %24 = math.rsqrt %23 : vector<1x128xf32>
    %25 = arith.mulf %21, %24 : vector<1x128xf32>
    %c0_20 = arith.constant 0 : index
    %c0_21 = arith.constant 0 : index
    %26 = vector.load %arg3[%c0_20, %c0_21] : memref<1x128xf32, #tpu.memory_space<vmem>>, vector<1x128xf32>
    %27 = arith.mulf %18, %25 : vector<1x128xf32>
    %28 = arith.subf %26, %27 : vector<1x128xf32>
    %29 = vector.broadcast %25 : vector<1x128xf32> to vector<64x128xf32>
    %30 = arith.mulf %1, %29 : vector<64x128xf32>
    %31 = vector.broadcast %28 : vector<1x128xf32> to vector<64x128xf32>
    %32 = arith.addf %30, %31 : vector<64x128xf32>
    %33 = arith.truncf %32 : vector<64x128xf32> to vector<64x128xbf16>
    %c0_22 = arith.constant 0 : index
    %c0_23 = arith.constant 0 : index
    %34 = vector.load %arg6[%c0_22, %c0_23] : memref<128x128xbf16, #tpu.memory_space<vmem>>, vector<128x128xbf16>
    %cst_24 = arith.constant dense<0.000000e+00> : vector<64x128xf32>
    %35 = tpu.matmul %33, %34, %cst_24 {dimension_numbers = #tpu.dot_dimension_numbers<[1], [0], [0], [1], [0, 0, 1, 1], [], []>} : vector<64x128xbf16>, vector<128x128xbf16>, vector<64x128xf32> -> vector<64x128xf32>
    %c0_25 = arith.constant 0 : index
    %c0_26 = arith.constant 0 : index
    %36 = vector.load %arg7[%c0_25, %c0_26] : memref<1x128xf32, #tpu.memory_space<vmem>>, vector<1x128xf32>
    %37 = vector.broadcast %36 : vector<1x128xf32> to vector<64x128xf32>
    %38 = arith.addf %35, %37 : vector<64x128xf32>
    %c0_27 = arith.constant 0 : index
    %c0_28 = arith.constant 0 : index
    %c0_29 = arith.constant 0 : index
    %39 = vector.load %arg8[%c0_27, %c0_28, %c0_29] : memref<1x64x128xf32, #tpu.memory_space<vmem>>, vector<1x64x128xf32>
    %40 = vector.shape_cast %39 : vector<1x64x128xf32> to vector<64x128xf32>
    %41 = vector.shape_cast %38 : vector<64x128xf32> to vector<1x64x128xf32>
    tpu.vector_store %arg8[%c0_27, %c0_28, %c0_29], %41 {strides = array<i32>} : memref<1x64x128xf32, #tpu.memory_space<vmem>>, vector<1x64x128xf32>,
    return
  }
  func.func @transform_0(%arg0: i32) -> (i32, i32, i32) {
    %c0_i32 = arith.constant 0 : i32
    %c0_i32_0 = arith.constant 0 : i32
    %c0_i32_1 = arith.constant 0 : i32
    return %arg0, %c0_i32, %c0_i32_0 : i32, i32, i32
  }
  func.func @transform_1(%arg0: i32) -> (i32, i32) {
    %c0_i32 = arith.constant 0 : i32
    %c0_i32_0 = arith.constant 0 : i32
    %c0_i32_1 = arith.constant 0 : i32
    return %c0_i32, %c0_i32_0 : i32, i32
  }
  func.func @transform_2(%arg0: i32) -> (i32, i32) {
    %c0_i32 = arith.constant 0 : i32
    %c0_i32_0 = arith.constant 0 : i32
    %c0_i32_1 = arith.constant 0 : i32
    return %c0_i32, %c0_i32_0 : i32, i32
  }
  func.func @transform_3(%arg0: i32) -> (i32, i32) {
    %c0_i32 = arith.constant 0 : i32
    %c0_i32_0 = arith.constant 0 : i32
    %c0_i32_1 = arith.constant 0 : i32
    return %c0_i32, %c0_i32_0 : i32, i32
  }
  func.func @transform_4(%arg0: i32) -> (i32, i32) {
    %c0_i32 = arith.constant 0 : i32
    %c0_i32_0 = arith.constant 0 : i32
    %c0_i32_1 = arith.constant 0 : i32
    return %c0_i32, %c0_i32_0 : i32, i32
  }
  func.func @transform_5(%arg0: i32) -> (i32, i32) {
    %c0_i32 = arith.constant 0 : i32
    %c0_i32_0 = arith.constant 0 : i32
    %c0_i32_1 = arith.constant 0 : i32
    return %c0_i32, %c0_i32_0 : i32, i32
  }
  func.func @transform_6(%arg0: i32) -> (i32, i32) {
    %c0_i32 = arith.constant 0 : i32
    %c0_i32_0 = arith.constant 0 : i32
    %c0_i32_1 = arith.constant 0 : i32
    return %c0_i32, %c0_i32_0 : i32, i32
  }
  func.func @transform_7(%arg0: i32) -> (i32, i32, i32) {
    %c0_i32 = arith.constant 0 : i32
    %c0_i32_0 = arith.constant 0 : i32
    %c0_i32_1 = arith.constant 0 : i32
    return %arg0, %c0_i32, %c0_i32_0 : i32, i32, i32
  }
}

</mosaic_0001>

<bundles_post_ra>
// kernel: tpu_custom_call.1
= control target key start
LH: loop header
LB: loop body
LE: loop exit
PB: predicated region body
PF: predicated region fallthrough
CT: control target
= control target key end

     0   :  { %12 = vsyncpa [#allocation3], 0  ;;  %s1700_s0 = inlined_call_operand.vmem [shape: f32[2,64,128], index: 0, kind: input, shape index: {}]   ;;  %s1701_s1 = inlined_call_operand.vmem [shape: f32[1,128], index: 1, kind: input, shape index: {}]   ;;  %s1702_s2 = inlined_call_operand.vmem [shape: f32[1,128], index: 2, kind: input, shape index: {}]   ;;  %s1703_s3 = inlined_call_operand.vmem [shape: f32[128,32], index: 3, kind: input, shape index: {}]   ;;  %s1704_s4 = inlined_call_operand.vmem [shape: f32[32,128], index: 4, kind: input, shape index: {}]   ;;  %s1705_s5 = inlined_call_operand.hbm [shape: bf16[128,128], index: 5, kind: input, shape index: {}]   ;;  %s1706_s6 = inlined_call_operand.vmem [shape: f32[1,128], index: 6, kind: input, shape index: {}]   ;;  %s1707_s7 = inlined_call_operand.hbm [shape: f32[2,64,128], index: 7, kind: output, shape index: {}]  }
   0x1   :  { %13 = vsyncpa [#allocation4], 0 }
   0x2   :  { %15 = vsyncpa [#allocation4 + $0x1], 0  ;;  %s1387_s24 = smov 0   ;;  %s1389_s25 = smov 0  }
   0x3   :  { %s1391_s26 = smov 0   ;;  %s1393_s27 = smov 0  }
   0x4 LB: > { %s1408_s28 = sadd.s32 4294967295, %s1336_s27   ;;  %s916_s29 = sadd.s32 4294967294, %s1336_s27   ;;  %s1336_s27 = sphi %s1393_s27, %s1723_s27   ;;  %s1332_s26 = sphi %s1391_s26, %s1722_s26   ;;  %s1328_s25 = sphi %s1389_s25, %s1721_s25   ;;  %s1324_s24 = sphi %s1387_s24, %s1720_s24  }
   0x5   : > { %s1412_s30 = sadd.s32 1, %s1336_s27   ;;  %s180_s8 = sadd.s32 1, %s1332_s26 }
   0x6   : > { %s177_s9 = ssub.s32 %s1336_s27, %s1412_s30  ;;  %p190_p0 = scmp.ne.s32.totalorder %s1332_s26, %s1328_s25 }
   0x7   : > { %p178_p1 = scmp.eq.s32.totalorder %s177_s9, 0  ;;  %p191_p2 = scmp.eq.s32.totalorder %s1408_s28, 1 }
   0x8   : > { %p196_p3 = scmp.ne.s32.totalorder %s1328_s25, %s1324_s24  ;;  %p197_p4 = scmp.eq.s32.totalorder %s916_s29, 1 }
   0x9   : > { %s1423_s10 = scalar_select %p178_p1, %s1332_s26, %s180_s8  }
   0xa   : > { %p1425_p5 = por %p191_p2, %p190_p0  ;;  %p1429_p6 = por %p197_p4, %p196_p3 }
   0xb   : > { %p917_p7 = scmp.ge.s32.totalorder %s1336_s27, 1  ;;  %p204_p8 = scmp.lt.s32.totalorder %s1336_s27, 3 }
   0xc   : > { %s1711_s11 = scalar_select %p1425_p5, 1, 0 }
   0xd   : > { %s1712_s12 = scalar_select %p1429_p6, 1, 0 }
   0xe   : > { %p1708_p9 = scmp.eq.s32.totalorder %s1408_s28, 0  ;;  %p1436_p10 = pnand %p917_p7, %p204_p8 }
   0xf   : > { %s1338_s14 = smov [#allocation2]   ;;  %s1242_s19 = scalar_lea.hbm %s1705_s5, 1024 }
  0x10   : > { %s1713_s13 = scalar_select %p1436_p10, 1, 0 }
  0x11   : > { %s228_s15 = sshll.u32 %s1338_s14, 4  ;;  %p1181_p11 = pneg %p1436_p10  ;;  %s229_s15 = int_to_ptr.vmem [resolvable:$true] %s228_s15 }
  0x12   : > { %p1243_p13 = scmp.ne.s32.totalorder %s1705_s5, %s1242_s19  ;;  %p1249_p3 = scmp.lt.u32.totalorder %s1242_s19, %s1705_s5 }
  0x13   : > { %p1444_p12 = pnand %p1708_p9, %p1181_p11 }
  0x15   : > { %p1244_p0 = pneg %p1444_p12 }
  0x17   : > { %p1245_p1 = pnand %p1244_p0, %p1243_p13 }
  0x19   : > { %p1246_p2 = pneg %p1245_p1 }
  0x1b   : > { %p1251_p4 = pnand %p1249_p3, %p1246_p2 }
  0x1d   : > { %1254 = shalt.err (!%p1251_p4)
}
  0x1e   : > { %s1255_s29 = scalar_lea.vmem %s229_s15, 1024  ;;  %p1263_p9 = scmp.lt.s32.totalorder %s229_s15, %s229_s15 }
  0x1f   : > { %p1256_p7 = scmp.ne.s32.totalorder %s229_s15, %s1255_s29  ;;  %p1264_p6 = scmp.lt.s32.totalorder %s1255_s29, %s1255_s29 }
  0x21   : > { %p1258_p8 = pnand %p1256_p7, %p1244_p0  ;;  %p1265_p5 = por %p1264_p6, %p1263_p9 }
  0x23   : > { %p1259_p11 = pneg %p1258_p8 }
  0x25   : > { %p1266_p10 = pnand %p1265_p5, %p1259_p11 }
  0x27   : > { %1269 = shalt.err (!%p1266_p10)
}
  0x28   : > { %s1339_s8 = smov 64   ;;  %s1340_s9 = smov 4  }
  0x29   : > { %1184 = dma.hbm_to_vmem [thread:$0]  (!%p1444_p12), %s1705_s5, 1024, %s229_s15, [#allocation3], %s1339_s8, %s1339_s8, %s1340_s9  }
  0x2a   : > { %p1715_p13 = scmp.ne.s32.totalorder %s1713_s13, 0 }
  0x2b   : > { %p1716_p1 = scmp.eq.s32.totalorder (!%p1715_p13), %s1408_s28, 0 }
  0x2c   : > { %255 = sbr.rel (%p1715_p13) target bundleno = 812 (0x32c), region = 48 }
  0x33   : > { %1315 = dma.done.wait (%p1716_p1), [#allocation3], 1024   ;;  %p1717_p0 = pmov %p1716_p1 }
  0x34   : > { %p287_p5 = scmp.lt.s32.totalorder %s1408_s28, 1  ;;  %v1341_v0 = vmov 0.0|0.0   ;;  %vm1342_vm0 = vmmov 0   ;;  %v1343_v1 = vmov 0.0   ;;  %v335_v2 = vld [vmem:[%s1703_s3] sm:$0xff]  ;;  %v336_v3 = vld [vmem:[%s1703_s3 + $0x8] sm:$0xff] }
  0x35   : > { %1317 = vsyncadd (%p1717_p0), [#allocation3], 4294966272  ;;  %1115 = vmatprep.subr.bf16.mxu1 %v1341_v0  ;;  %1031 = vmatprep.mubr.msk.f32.mxu1 %vm1342_vm0, %v1343_v1  ;;  %v337_v4 = vld [vmem:[%s1703_s3 + $0x10] sm:$0xff]  ;;  %v1487_v5 = vpack.c.bf16 %v336_v3, %v335_v2  ;;  %v338_v6 = vld [vmem:[%s1703_s3 + $0x18] sm:$0xff]  ;;  %vm499_vm1 = vcmask 261120   ;;  %s284_s22 = sand.u32 1, %s1328_s25  }
  0x36   : > { %s288_s15 = scalar_select %p287_p5, %s1408_s28, 1  ;;  %1163 = vmatprep.subr.bf16.mxu0 %v1341_v0  ;;  %1077 = vmatprep.mubr.msk.f32.mxu0 %vm1342_vm0, %v1343_v1  ;;  %v1498_v7 = vpack.c.bf16 %v338_v6, %v337_v4  ;;  %v339_v8 = vld [vmem:[%s1703_s3 + $0x20] sm:$0xff]  ;;  %v340_v9 = vld [vmem:[%s1703_s3 + $0x28] sm:$0xff]  ;;  %v341_v12 = vld [vmem:[%s1703_s3 + $0x30] sm:$0xff] }
  0x37   : > { %1117 = vmatpush3.bf16.msra.mxu1 %v1487_v5  ;;  %v1522_v15 = vpack.c.bf16 %v340_v9, %v339_v8  ;;  %v342_v16 = vld [vmem:[%s1703_s3 + $0x38] sm:$0xff]  ;;  %v495_v20 = vld [vmem:[%s1704_s4] sm:$0xff]  ;;  %v496_v21 = vld [vmem:[%s1704_s4 + $0x8] sm:$0xff]  ;;  %s922_s23 = sshll.u32 %s284_s22, 6  ;;  %p1718_p9 = scmp.ne.s32.totalorder %s1711_s11, 0 }
  0x38   : > { %s941_s13 = sshll.u32 %s288_s15, 6  ;;  %1118 = vmatprep.subr.bf16.mxu1 %v1341_v0  ;;  %v1544_v23 = vpack.c.bf16 %v496_v21, %v495_v20  ;;  %v343_v24 = vld [vmem:[%s1703_s3 + $0x40] sm:$0xff]  ;;  %v344_v25 = vld [vmem:[%s1703_s3 + $0x48] sm:$0xff]  ;;  %v1125_v29 = vpack.c.bf16 %v342_v16, %v341_v12  ;;  %v345_v37 = vld [vmem:[%s1703_s3 + $0x50] sm:$0xff]  ;;  %s286_s9 = scalar_lea.vmem [#allocation5], %s922_s23 }
  0x39   : > { %s1495_s14 = scalar_lea.vmem %s1700_s0, %s941_s13  ;;  %v1128_v35 = vpack.c.bf16 %v344_v25, %v343_v24  ;;  %v346_v38 = vld [vmem:[%s1703_s3 + $0x58] sm:$0xff]  ;;  %v347_v44 = vld [vmem:[%s1703_s3 + $0x60] sm:$0xff]  ;;  %v348_v45 = vld [vmem:[%s1703_s3 + $0x68] sm:$0xff]  ;;  %s842_s17 = sshll.u32 %s286_s9, 4  ;;  %s1650_s17 = int_to_ptr.vmem [resolvable:$true] %s842_s17 }
  0x3a   : > { %v1508_v10 = vld [vmem:[%s1495_s14] sm:$0xff]  ;;  %v1511_v11 = vld [vmem:[%s1495_s14 + $0x8] sm:$0xff]  ;;  %v1517_v13 = vld [vmem:[%s1495_s14 + $0x10] sm:$0xff]  ;;  %1165 = vmatpush3.bf16.msra.mxu0 %v1544_v23  ;;  %v1131_v43 = vpack.c.bf16 %v346_v38, %v345_v37  ;;  %v1134_v50 = vpack.c.bf16 %v348_v45, %v347_v44  ;;  %s942_s15 = sshll.u32 %s1408_s28, 10  ;;  %s1659_s28 = scalar_lea.sflag [#allocation4], %s284_s22 }
  0x3b   : > { %v301_v14 = vadd.f32 %v1511_v11, %v1508_v10  ;;  %1120 = vmatpush3.bf16.msra.mxu1 %v1498_v7  ;;  %v1528_v17 = vld [vmem:[%s1495_s14 + $0x18] sm:$0xff]  ;;  %v1531_v18 = vld [vmem:[%s1495_s14 + $0x20] sm:$0xff]  ;;  %v1542_v22 = vld [vmem:[%s1495_s14 + $0x28] sm:$0xff]  ;;  %v314_v27 = vmul.f32 %v1508_v10, %v1508_v10  ;;  %v315_v28 = vmul.f32 %v1511_v11, %v1511_v11  ;;  %1166 = vmatprep.subr.bf16.mxu0 %v1341_v0  ;;  %s1655_s13 = scalar_lea.hbm %s1707_s7, %s942_s15  ;;  %s1270_s19 = scalar_lea.vmem %s1650_s17, 1024 }
  0x3c   : > { %1121 = vmatprep.subr.bf16.mxu1 %v1341_v0  ;;  %v1559_v30 = vld [vmem:[%s1495_s14 + $0x30] sm:$0xff]  ;;  %v316_v33 = vmul.f32 %v1517_v13, %v1517_v13  ;;  %v1569_v36 = vld [vmem:[%s1495_s14 + $0x38] sm:$0xff]  ;;  %v317_v41 = vmul.f32 %v1528_v17, %v1528_v17  ;;  %v318_v48 = vmul.f32 %v1531_v18, %v1531_v18  ;;  %v319_v55 = vmul.f32 %v1542_v22, %v1542_v22  ;;  %v649_v45 = vld [vmem:[%s1702_s2] sm:$0x1]  ;;  %p1271_p6 = scmp.ne.s32.totalorder %s1650_s17, %s1270_s19  ;;  %s1344_s20 = smov [#allocation5]  }
  0x3d   : > { %v302_v19 = vadd.f32 %v301_v14, %v1517_v13  ;;  %v322_v34 = vadd.f32 %v315_v28, %v314_v27  ;;  %v349_v51 = vld [vmem:[%s1703_s3 + $0x70] sm:$0xff]  ;;  %v350_v52 = vld [vmem:[%s1703_s3 + $0x78] sm:$0xff]  ;;  %v320_v60 = vmul.f32 %v1559_v30, %v1559_v30  ;;  %v321_v62 = vmul.f32 %v1569_v36, %v1569_v36  ;;  %v1232_v27 = vld [vmem:[#allocation2] sm:$0xff]   ;;  %s1274_s14 = sshll.u32 %s1344_s20, 4  ;;  %s1275_s14 = int_to_ptr.vmem [resolvable:$false] %s1274_s14 }
  0x3e   : > { %v1137_v57 = vpack.c.bf16 %v350_v52, %v349_v51  ;;  %v497_v9 = vld [vmem:[%s1704_s4 + $0x10] sm:$0xff]  ;;  %v498_v12 = vld [vmem:[%s1704_s4 + $0x18] sm:$0xff]  ;;  %v1233_v28 = vld [vmem:[#allocation2 + $0x8] sm:$0xff]   ;;  %p1272_p10 = pnand %p1271_p6, %p1718_p9  ;;  %s1276_s21 = scalar_lea.vmem %s1275_s14, 2048 }
  0x3f   : > { %v303_v26 = vadd.f32 %v302_v19, %v1528_v17  ;;  %1123 = vmatpush3.bf16.msra.mxu1 %v1522_v15  ;;  %v323_v42 = vadd.f32 %v322_v34, %v316_v33  ;;  %v1167_v14 = vpack.c.bf16 %v498_v12, %v497_v9  ;;  %p1277_p2 = scmp.lt.s32.totalorder %s1650_s17, %s1275_s14  ;;  %p1278_p3 = scmp.lt.s32.totalorder %s1276_s21, %s1270_s19 }
  0x40   : > { %1124 = vmatprep.subr.bf16.mxu1 %v1341_v0  ;;  %p1273_p12 = pneg %p1272_p10 }
  0x41   : > { %v304_v31 = vadd.f32 %v303_v26, %v1531_v18  ;;  %v324_v49 = vadd.f32 %v323_v42, %v317_v41  ;;  %1168 = vmatpush3.bf16.msra.mxu0 %v1167_v14  ;;  %v573_v41 = vld [vmem:[%s1701_s1] sm:$0x1]  ;;  %p1279_p4 = por %p1278_p3, %p1277_p2 }
  0x42   : > { %1169 = vmatprep.subr.bf16.mxu0 %v1341_v0 }
  0x43   : > { %v305_v32 = vadd.f32 %v304_v31, %v1542_v22  ;;  %1126 = vmatpush3.bf16.msra.mxu1 %v1125_v29  ;;  %v325_v56 = vadd.f32 %v324_v49, %v318_v48  ;;  %v1238_v31 = vld [vmem:[#allocation2 + $0x30] sm:$0xff]   ;;  %p1280_p7 = pnand %p1279_p4, %p1273_p12 }
  0x44   : > { %1127 = vmatprep.subr.bf16.mxu1 %v1341_v0 }
  0x45   : > { %v306_v39 = vadd.f32 %v305_v32, %v1559_v30  ;;  %v326_v61 = vadd.f32 %v325_v56, %v319_v55  ;;  %v1239_v32 = vld [vmem:[#allocation2 + $0x38] sm:$0xff]  }
  0x47   : > { %v307_v40 = vadd.f32 %v306_v39, %v1569_v36  ;;  %1129 = vmatpush3.bf16.msra.mxu1 %v1128_v35  ;;  %v327_v63 = vadd.f32 %v326_v61, %v320_v60  ;;  %v653_v39 = vlaneseq }
  0x48   : > { %1130 = vmatprep.subr.bf16.mxu1 %v1341_v0 }
  0x49   : > { %v308_v46 = vrot.slane %v307_v40, 4  ;;  %v328_v2 = vadd.f32 %v327_v63, %v321_v62 }
  0x4b   : > { %v309_v47 = vadd.f32 %v308_v46, %v307_v40  ;;  %1132 = vmatpush3.bf16.msra.mxu1 %v1131_v43  ;;  %v329_v3 = vrot.slane %v328_v2, 4  ;;  %v654_v40 = vshrl.u32 %v653_v39, 7 }
  0x4c   : > { %1133 = vmatprep.subr.bf16.mxu1 %v1341_v0 }
  0x4d   : > { %v310_v53 = vrot.slane %v309_v47, 2  ;;  %v330_v4 = vadd.f32 %v329_v3, %v328_v2  ;;  %v655_v42 = vsub.s32 0, %v654_v40 }
  0x4f   : > { %v311_v54 = vadd.f32 %v310_v53, %v309_v47  ;;  %1135 = vmatpush3.bf16.msra.mxu1 %v1134_v50 }
  0x50   : > { %1136 = vmatprep.subr.bf16.mxu1 %v1341_v0 }
  0x51   : > { %v312_v58 = vrot.slane %v311_v54, 1 }
  0x53   : > { %v313_v59 = vadd.f32 %v312_v58, %v311_v54  ;;  %1138 = vmatpush3.bf16.msra.mxu1 %v1137_v57 }
  0x54   : > { %1139 = vmatprep.subr.bf16.mxu1 %v1341_v0 }
  0x56   : > { %1032 = vmatmul.mubr.f32.vlgmr.msra.gmra.mrb[0].mxu1 %v313_v59 }
  0x57   : > { %1141 = vmatpush3.bf16.msra.mxu1 %v1487_v5  ;;  %1066 = vmatprep.mubr.msk.f32.mxu1 %vm1342_vm0, %v1343_v1  ;;  %v331_v5 = vrot.slane %v330_v4, 2 }
  0x58   : > { %1142 = vmatprep.subr.bf16.mxu1 %v1341_v0 }
  0x59   : > { %v332_v6 = vadd.f32 %v331_v5, %v330_v4 }
  0x5b   : > { %1144 = vmatpush3.bf16.msra.mxu1 %v1498_v7  ;;  %v333_v7 = vrot.slane %v332_v6, 1 }
  0x5c   : > { %1145 = vmatprep.subr.bf16.mxu1 %v1341_v0 }
  0x5d   : > { %v334_v8 = vadd.f32 %v333_v7, %v332_v6 }
  0x5f   : > { %1147 = vmatpush3.bf16.msra.mxu1 %v1522_v15 }
  0x60   : > { %1148 = vmatprep.subr.bf16.mxu1 %v1341_v0 }
  0x63   : > { %1150 = vmatpush3.bf16.msra.mxu1 %v1125_v29  ;;  %v1234_v29 = vld [vmem:[#allocation2 + $0x10] sm:$0xff]  }
  0x64   : > { %1151 = vmatprep.subr.bf16.mxu1 %v1341_v0 }
  0x67   : > { %1153 = vmatpush3.bf16.msra.mxu1 %v1128_v35 }
  0x68   : > { %1154 = vmatprep.subr.bf16.mxu1 %v1341_v0 }
  0x6b   : > { %1156 = vmatpush3.bf16.msra.mxu1 %v1131_v43 }
  0x6c   : > { %1157 = vmatprep.subr.bf16.mxu1 %v1341_v0 }
  0x6f   : > { %1159 = vmatpush3.bf16.msra.mxu1 %v1134_v50 }
  0x70   : > { %1160 = vmatprep.subr.bf16.mxu1 %v1341_v0 }
  0x73   : > { %1162 = vmatpush3.bf16.msra.mxu1 %v1137_v57 }
  0x76   : > { %1067 = vmatmul.mubr.f32.vlgmr.msra.gmra.mrb[2].mxu1 %v334_v8 }
 0x129   : > { %v417_v15 = vpop.f32.mrb[0].mxu1 }
 0x12a   : > { %v491_v16 = vmul.f32 0.00390625, %v417_v15  ;;  %v1033_v19 = vpop.f32.mrb[1].mxu1 }
 0x12c   : > { %1078 = vmatmul.mubr.msk.f32.vlgmr.msra.gmra.mrb[0].mxu0 %vm499_vm1, %v491_v16  ;;  %v493_v21 = vmul.f32 %v491_v16, %v491_v16 }
 0x12d   : > { %1171 = vmatpush3.bf16.msra.mxu0 %v1544_v23  ;;  %1088 = vmatprep.mubr.msk.f32.mxu0 %vm1342_vm0, %v1343_v1  ;;  %v1235_v23 = vld [vmem:[#allocation2 + $0x18] sm:$0xff]   ;;  %v1237_v1 = vld [vmem:[#allocation2 + $0x28] sm:$0xff]  }
 0x12e   : > { %1172 = vmatprep.subr.bf16.mxu0 %v1341_v0  ;;  %v1236_v0 = vld [vmem:[#allocation2 + $0x20] sm:$0xff]  }
 0x131   : > { %1174 = vmatpush3.bf16.msra.mxu0 %v1167_v14 }
 0x132   : > { %1091 = vmatprep.subr.bf16.mxu0 %v1232_v27 }
 0x149   : > { %v487_v20 = vpop.f32.mrb[2].mxu1 }
 0x14a   : > { %v492_v24 = vmul.f32 0.00390625, %v487_v20  ;;  %v1068_v25 = vpop.f32.mrb[3].mxu1 }
 0x14c   : > { %v494_v26 = vsub.f32 %v492_v24, %v493_v21 }
 0x14e   : > { %1089 = vmatmul.mubr.msk.f32.vlgmr.msra.gmra.mrb[2].mxu0 %vm499_vm1, %v494_v26 }
 0x14f   : > { %1092 = vmatpush3.bf16.msra.mxu0 %v1232_v27 }
 0x150   : > { %1093 = vmatprep.subr.bf16.mxu0 %v1233_v28 }
 0x153   : > { %1094 = vmatpush3.bf16.msra.mxu0 %v1233_v28 }
 0x154   : > { %1095 = vmatprep.subr.bf16.mxu0 %v1234_v29 }
 0x157   : > { %1096 = vmatpush3.bf16.msra.mxu0 %v1234_v29 }
 0x158   : > { %1097 = vmatprep.subr.bf16.mxu0 %v1235_v23 }
 0x15b   : > { %1098 = vmatpush3.bf16.msra.mxu0 %v1235_v23 }
 0x15c   : > { %1099 = vmatprep.subr.bf16.mxu0 %v1236_v0 }
 0x15f   : > { %1100 = vmatpush3.bf16.msra.mxu0 %v1236_v0 }
 0x160   : > { %1101 = vmatprep.subr.bf16.mxu0 %v1237_v1 }
 0x163   : > { %1102 = vmatpush3.bf16.msra.mxu0 %v1237_v1 }
 0x164   : > { %1103 = vmatprep.subr.bf16.mxu0 %v1238_v31 }
 0x167   : > { %1104 = vmatpush3.bf16.msra.mxu0 %v1238_v31 }
 0x168   : > { %1105 = vmatprep.subr.bf16.mxu0 %v1239_v32 }
 0x16b   : > { %1106 = vmatpush3.bf16.msra.mxu0 %v1239_v32 }
 0x1ff   : > { %v569_v33 = vpop.f32.mrb[0].mxu0 }
 0x200   : > { %v1079_v34 = vpop.f32.mrb[1].mxu0 }
 0x221   : > { %v643_v35 = vpop.f32.mrb[2].mxu0 }
 0x222   : > { %v644_v37 = vadd.f32 1e-06, %v643_v35  ;;  %v1090_v38 = vpop.f32.mrb[3].mxu0 }
 0x224   : > { %1240 = vrsqrt.f32 %v644_v37 }
 0x22e   : > { %v1241_v43 = vpop.eup %1240 }
 0x22f   : > { %v648_v44 = vmul.f32 %v1241_v43, %v573_v41 }
 0x231   : > { %v650_v46 = vmul.f32 %v648_v44, %v569_v33  ;;  %v656_v47 = vrot.slane %v648_v44, %v655_v42 }
 0x233   : > { %v651_v48 = vsub.f32 %v649_v45, %v650_v46  ;;  %v658_v49 = vmul.f32 %v656_v47, %v1508_v10  ;;  %v659_v51 = vmul.f32 %v656_v47, %v1511_v11  ;;  %v660_v52 = vmul.f32 %v656_v47, %v1517_v13 }
 0x234   : > { %v661_v53 = vmul.f32 %v656_v47, %v1528_v17  ;;  %v662_v54 = vmul.f32 %v656_v47, %v1531_v18  ;;  %v663_v55 = vmul.f32 %v656_v47, %v1542_v22  ;;  %v664_v56 = vmul.f32 %v656_v47, %v1559_v30  ;;  %v927_v22 = vld [vmem:[%s1706_s6] ss:$0 sm:$0xff] }
 0x235   : > { %v670_v50 = vrot.slane %v651_v48, %v655_v42  ;;  %v665_v57 = vmul.f32 %v656_v47, %v1569_v36 }
 0x237   : > { %v672_v58 = vadd.f32 %v670_v50, %v658_v49  ;;  %v673_v59 = vadd.f32 %v670_v50, %v659_v51  ;;  %v674_v10 = vadd.f32 %v670_v50, %v660_v52  ;;  %v675_v60 = vadd.f32 %v670_v50, %v661_v53 }
 0x238   : > { %v676_v61 = vadd.f32 %v670_v50, %v662_v54  ;;  %v677_v11 = vadd.f32 %v670_v50, %v663_v55  ;;  %v678_v62 = vadd.f32 %v670_v50, %v664_v56  ;;  %v679_v13 = vadd.f32 %v670_v50, %v665_v57 }
 0x239   : > { %v680_v63 = vpack.c.bf16 %v673_v59, %v672_v58  ;;  %v681_v17 = vpack.c.bf16 %v675_v60, %v674_v10 }
 0x23a   : > { %v682_v2 = vpack.c.bf16 %v677_v11, %v676_v61  ;;  %v683_v18 = vpack.c.bf16 %v679_v13, %v678_v62 }
 0x23b   : > { %1107 = vmatprep.mubr.bf16.mxu0 %v680_v63 }
 0x23c   : > { %1108 = vmatmul.mubr.bf16.vlgmr.msra.gmra.mrb[4].mxu0 %v681_v17 }
 0x23d   : > { %1111 = vmatprep.mubr.bf16.mxu0 %v682_v2 }
 0x244   : > { %1112 = vmatmul.mubr.bf16.gmra.mrb[8].mxu0 %v683_v18 }
 0x30f   : > { %v1109_v30 = vpop.f32.mrb[4].mxu0 }
 0x310   : > { %v798_v36 = vadd.f32 %v1109_v30, %v927_v22  ;;  %v789_v3 = vpop.f32.mrb[5].mxu0 }
 0x311   : > { %v790_v4 = vadd.f32 %v927_v22, %v789_v3  ;;  %v1110_v5 = vpop.f32.mrb[6].mxu0 }
 0x312   : > { %822 = vst [vmem:[%s286_s9 + $0x10] sm:$0xff] %v798_v36  ;;  %v801_v6 = vadd.f32 %v1110_v5, %v927_v22  ;;  %v792_v7 = vpop.f32.mrb[7].mxu0 }
 0x313   : > { %820 = vst [vmem:[%s286_s9] sm:$0xff] %v790_v4  ;;  %v793_v8 = vadd.f32 %v927_v22, %v792_v7 }
 0x314   : > { %823 = vst [vmem:[%s286_s9 + $0x18] sm:$0xff] %v801_v6 }
 0x315   : > { %821 = vst [vmem:[%s286_s9 + $0x8] sm:$0xff] %v793_v8 }
 0x317   : > { %v1113_v9 = vpop.f32.mrb[8].mxu0 }
 0x318   : > { %v814_v12 = vadd.f32 %v1113_v9, %v927_v22  ;;  %v805_v14 = vpop.f32.mrb[9].mxu0 }
 0x319   : > { %v806_v15 = vadd.f32 %v927_v22, %v805_v14  ;;  %v1114_v16 = vpop.f32.mrb[10].mxu0 }
 0x31a   : > { %826 = vst [vmem:[%s286_s9 + $0x30] sm:$0xff] %v814_v12  ;;  %v817_v19 = vadd.f32 %v1114_v16, %v927_v22  ;;  %v808_v20 = vpop.f32.mrb[11].mxu0 }
 0x31b   : > { %824 = vst [vmem:[%s286_s9 + $0x20] sm:$0xff] %v806_v15  ;;  %v809_v21 = vadd.f32 %v927_v22, %v808_v20 }
 0x31c   : > { %827 = vst [vmem:[%s286_s9 + $0x38] sm:$0xff] %v817_v19 }
 0x31d   : > { %825 = vst [vmem:[%s286_s9 + $0x28] sm:$0xff] %v809_v21 }
 0x31e   : > { %1283 = shalt.err (!%p1280_p7)
}
 0x31f   : > { %s1284_s22 = scalar_lea.hbm %s1655_s13, 1024  ;;  %s1288_s8 = scalar_lea.hbm %s1707_s7, 2048 }
 0x320   : > { %p1285_p8 = scmp.ne.s32.totalorder %s1655_s13, %s1284_s22  ;;  %p1289_p1 = scmp.lt.u32.totalorder %s1655_s13, %s1707_s7 }
 0x321   : > { %p1290_p0 = scmp.lt.u32.totalorder %s1288_s8, %s1284_s22  ;;  %p1292_p6 = scmp.lt.u32.totalorder %s1284_s22, %s1655_s13 }
 0x322   : > { %p1286_p11 = pnand %p1285_p8, %p1718_p9 }
 0x323   : > { %p1291_p5 = por %p1290_p0, %p1289_p1 }
 0x324   : > { %p1287_p13 = pneg %p1286_p11 }
 0x325   : > { %p1293_p10 = por %p1292_p6, %p1291_p5 }
 0x327   : > { %p1294_p12 = pnand %p1293_p10, %p1287_p13 }
 0x329   : > { %1297 = shalt.err (!%p1294_p12)
}
 0x32a   : > { %s1345_s16 = smov 128   ;;  %s1346_s18 = smov 8  }
 0x32b   : > { %1179 = dma.vmem_to_hbm [thread:$0]  (%p1718_p9), %s1650_s17, 1024, %s1655_s13, %s1659_s28, %s1345_s16, %s1345_s16, %s1346_s18  }
 0x32c PF: > { %p1191_p2 = scmp.ge.s32.totalorder %s1336_s27, 2  ;;  %s857_s19 = sand.u32 1, %s1324_s24  }
 0x32d   : > { %p1719_p3 = scmp.ne.s32.totalorder %s1712_s12, 0  ;;  %s858_s20 = scalar_lea.sflag [#allocation4], %s857_s19 }
 0x32f   : > { %p1186_p4 = pnand %p1191_p2, %p1719_p3 }
 0x331   : > { %1319 = dma.done.wait (!%p1186_p4), %s858_s20, 1024  }
 0x332   : > { %1321 = vsyncadd (!%p1186_p4), %s858_s20, 4294966272  ;;  %p18_p7 = scmp.ge.s32.totalorder %s1412_s30, 4   ;;  %s1720_s24 = smov %s1328_s25 }
 0x333   : > { %s1721_s25 = smov %s1332_s26  ;;  %s1722_s26 = smov %s1423_s10 }
 0x334   : > { %s1723_s27 = smov %s1412_s30  ;;  %20 = sbr.rel (!%p18_p7) target bundleno = 4 (0x4), region = 88 }
 0x33b   :  { %863 = vsyncpa [#allocation3], 1 }
 0x33c   :  { %865 = vsyncpa [#allocation3 + $0x1], 1 }
 0x33d   :  { %866 = vsyncpa [#allocation4], 1 }
 0x33e   :  { %868 = vsyncpa [#allocation4 + $0x1], 1 }

</bundles_post_ra>
